<compile_context>
chip_gen: v7x
topology: tpu7x:2x2x1
jax: 0.10.0
libtpu: 0.0.40
codegen_flags: <defaults>
</compile_context>

<pallas_src>
import jax
import jax.numpy as jnp
from jax.experimental import pallas as pl
from jax.experimental.pallas import tpu as pltpu

LANE = 128  # lane width of a vreg / MXU column alignment


def _round_up(n, m):
    return ((n + m - 1) // m) * m


def dqn_kernel(x_ref, w1_ref, b1_ref, w2_ref, b2_ref, w3_ref, b3_ref, o_ref):
    # One batch tile per grid step; the whole (hidden-padded) weight set stays
    # resident in VMEM.  bf16 operands on the MXU, f32 accumulation, f32 bias adds.
    x = x_ref[...].astype(jnp.bfloat16)                                      # [tb, in]
    h = jnp.dot(x, w1_ref[...], preferred_element_type=jnp.float32) + b1_ref[...]
    h = jnp.maximum(h, 0.0).astype(jnp.bfloat16)                             # [tb, hid_p]
    h = jnp.dot(h, w2_ref[...], preferred_element_type=jnp.float32) + b2_ref[...]
    h = jnp.maximum(h, 0.0).astype(jnp.bfloat16)
    y = jnp.dot(h, w3_ref[...], preferred_element_type=jnp.float32) + b3_ref[...]
    o_ref[...] = y.astype(o_ref.dtype)                                       # f32 [tb, out]


def prepare_dqn_params(params):
    """Pad the hidden dim to 128 lanes and cast weights to bf16 ONCE (hoist out of the
    per-call path — for DQN action selection this runs every env step)."""
    w1, b1 = params["w1"], params["b1"]
    w2, b2 = params["w2"], params["b2"]
    w3, b3 = params["w3"], params["b3"]
    in_size, hidden = w1.shape
    out_size = w3.shape[1]
    hid_p = _round_up(hidden, LANE)

    def pad2(a, rows, cols, dtype):
        return jnp.pad(a, ((0, rows - a.shape[0]), (0, cols - a.shape[1]))).astype(dtype)

    return {
        "w1": pad2(w1, in_size, hid_p, jnp.bfloat16),
        "b1": pad2(b1, 1, hid_p, jnp.float32),
        "w2": pad2(w2, hid_p, hid_p, jnp.bfloat16),
        "b2": pad2(b2, 1, hid_p, jnp.float32),
        "w3": pad2(w3, hid_p, out_size, jnp.bfloat16),
        "b3": pad2(b3, 1, out_size, jnp.float32),
        "hidden_size": hidden,
    }


def _choose_batch_tiling(B, batch_tile):
    b16 = _round_up(max(B, 1), 16)          # bf16 sublane packing (16, not the f32 8)
    n = pl.cdiv(b16, batch_tile)
    if b16 >= 512:                          # keep >=2 grid steps so both v7x TCs work
        n = max(n, 2)
    tb = _round_up(pl.cdiv(b16, n), 16)     # tile sized from cdiv -> padding stays small
    b_pad = n * tb
    return tb, b_pad, n


def dqn_forward(x, prepared, *, batch_tile=2048):
    """x: [B, input_size] f32.  prepared: output of prepare_dqn_params()."""
    w1, b1 = prepared["w1"], prepared["b1"]
    w2, b2 = prepared["w2"], prepared["b2"]
    w3, b3 = prepared["w3"], prepared["b3"]
    hidden = prepared["hidden_size"]

    B, in_size = x.shape
    hid_p = w1.shape[1]
    out_size = w3.shape[1]

    tb, b_pad, n = _choose_batch_tiling(B, batch_tile)
    if b_pad != B:
        x = jnp.pad(x, ((0, b_pad - B), (0, 0)))

    # True (unpadded-feature) work / traffic for XLA's scheduler.
    flops = 2 * b_pad * (in_size * hidden + hidden * hidden + hidden * out_size)
    bytes_accessed = (
        b_pad * in_size * 4                        # x read (f32)
        + (w1.size + w2.size + w3.size) * 2        # resident bf16 weights
        + (b1.size + b2.size + b3.size) * 4        # f32 biases
        + b_pad * out_size * 4                     # y write (f32)
    )

    const = lambda i: (0, 0)   # weights/biases: same block every step -> stay resident
    y_pad = pl.pallas_call(
        dqn_kernel,
        out_shape=jax.ShapeDtypeStruct((b_pad, out_size), jnp.float32),
        grid=(n,),
        in_specs=[
            pl.BlockSpec((tb, in_size), lambda i: (i, 0)),   # x: streamed, true width
            pl.BlockSpec((in_size, hid_p), const),
            pl.BlockSpec((1, hid_p), const),
            pl.BlockSpec((hid_p, hid_p), const),
            pl.BlockSpec((1, hid_p), const),
            pl.BlockSpec((hid_p, out_size), const),
            pl.BlockSpec((1, out_size), const),
        ],
        out_specs=pl.BlockSpec((tb, out_size), lambda i: (i, 0)),  # true-width output
        compiler_params=pltpu.CompilerParams(
            dimension_semantics=("parallel",),   # shard batch tiles across TCs (v7x)
        ),
        cost_estimate=pl.CostEstimate(
            flops=flops, transcendentals=0, bytes_accessed=bytes_accessed
        ),
    )(x, w1, b1, w2, b2, w3, b3)

    return y_pad[:B] if b_pad != B else y_pad


def init_dqn_params(key, input_size, hidden_size, output_size):
    """Deterministic init mirroring nn.Linear's U(-1/sqrt(fan_in), 1/sqrt(fan_in));
    weights stored [in, out] (transpose of nn.Linear) so the kernel runs x @ W + b."""
    ks = jax.random.split(key, 6)

    def linear(kw, kb, fan_in, fan_out):
        bound = 1.0 / (fan_in ** 0.5)
        w = jax.random.uniform(kw, (fan_in, fan_out), jnp.float32, -bound, bound)
        b = jax.random.uniform(kb, (1, fan_out), jnp.float32, -bound, bound)
        return w, b

    w1, b1 = linear(ks[0], ks[1], input_size, hidden_size)
    w2, b2 = linear(ks[2], ks[3], hidden_size, hidden_size)
    w3, b3 = linear(ks[4], ks[5], hidden_size, output_size)
    return {"w1": w1, "b1": b1, "w2": w2, "b2": b2, "w3": w3, "b3": b3}


def dqn_reference(x, p):
    """Pure-JAX reference with the same bf16-operand / f32-accumulate numerics."""
    bf = jnp.bfloat16
    h = jnp.dot(x.astype(bf), p["w1"].astype(bf), preferred_element_type=jnp.float32) + p["b1"]
    h = jnp.maximum(h, 0.0)
    h = jnp.dot(h.astype(bf), p["w2"].astype(bf), preferred_element_type=jnp.float32) + p["b2"]
    h = jnp.maximum(h, 0.0)
    y = jnp.dot(h.astype(bf), p["w3"].astype(bf), preferred_element_type=jnp.float32) + p["b3"]
    return y


if __name__ == "__main__":
    batch, input_size, hidden_size, output_size = 8, 16, 32, 4

    key = jax.random.PRNGKey(0)
    k_x, k_p = jax.random.split(key)
    x = jax.random.normal(k_x, (batch, input_size), jnp.float32)
    params = init_dqn_params(k_p, input_size, hidden_size, output_size)

    prepared = prepare_dqn_params(params)   # pad/cast weights once, reuse every call
    y = dqn_forward(x, prepared)
    y = jax.block_until_ready(y)

    y_ref = dqn_reference(x, params)
    assert y.shape == (batch, output_size)
    assert jnp.allclose(y, y_ref, atol=1e-3, rtol=1e-3), "mismatch vs JAX reference"

    print("KERNEL_OK")
</pallas_src>

<mosaic_0001>
module attributes {stable_mosaic.version = 11 : i64} {
  func.func @dqn_kernel(%arg0: i32, %arg1: memref<16x16xf32, #tpu.memory_space<vmem>>, %arg2: memref<16x128xbf16, #tpu.memory_space<vmem>>, %arg3: memref<1x128xf32, #tpu.memory_space<vmem>>, %arg4: memref<128x128xbf16, #tpu.memory_space<vmem>>, %arg5: memref<1x128xf32, #tpu.memory_space<vmem>>, %arg6: memref<128x4xbf16, #tpu.memory_space<vmem>>, %arg7: memref<1x4xf32, #tpu.memory_space<vmem>>, %arg8: memref<16x4xf32, #tpu.memory_space<vmem>>) attributes {dimension_semantics = [#tpu.dimension_semantics<parallel>], iteration_bounds = array<i64: 1>, scalar_prefetch = 0 : i64, scratch_operands = 0 : i64, tpu.core_type = #tpu.core_type<tc>, window_params = [{transform_indices = @transform_0, window_bounds = array<i64: 16, 16>}, {pipeline_mode = #tpu.pipeline_mode<synchronous>, transform_indices = @transform_1, window_bounds = array<i64: 16, 128>}, {pipeline_mode = #tpu.pipeline_mode<synchronous>, transform_indices = @transform_2, window_bounds = array<i64: 1, 128>}, {pipeline_mode = #tpu.pipeline_mode<synchronous>, transform_indices = @transform_3, window_bounds = array<i64: 128, 128>}, {pipeline_mode = #tpu.pipeline_mode<synchronous>, transform_indices = @transform_4, window_bounds = array<i64: 1, 128>}, {pipeline_mode = #tpu.pipeline_mode<synchronous>, transform_indices = @transform_5, window_bounds = array<i64: 128, 4>}, {pipeline_mode = #tpu.pipeline_mode<synchronous>, transform_indices = @transform_6, window_bounds = array<i64: 1, 4>}, {transform_indices = @transform_7, window_bounds = array<i64: 16, 4>}]} {
    %c0 = arith.constant 0 : index
    %c0_0 = arith.constant 0 : index
    %0 = vector.load %arg1[%c0, %c0_0] : memref<16x16xf32, #tpu.memory_space<vmem>>, vector<16x16xf32>
    %1 = arith.truncf %0 : vector<16x16xf32> to vector<16x16xbf16>
    %c0_1 = arith.constant 0 : index
    %c0_2 = arith.constant 0 : index
    %2 = vector.load %arg2[%c0_1, %c0_2] : memref<16x128xbf16, #tpu.memory_space<vmem>>, vector<16x128xbf16>
    %cst = arith.constant dense<0.000000e+00> : vector<16x128xf32>
    %3 = tpu.matmul %1, %2, %cst {dimension_numbers = #tpu.dot_dimension_numbers<[1], [0], [0], [1], [0, 0, 1, 1], [], []>} : vector<16x16xbf16>, vector<16x128xbf16>, vector<16x128xf32> -> vector<16x128xf32>
    %c0_3 = arith.constant 0 : index
    %c0_4 = arith.constant 0 : index
    %4 = vector.load %arg3[%c0_3, %c0_4] : memref<1x128xf32, #tpu.memory_space<vmem>>, vector<1x128xf32>
    %5 = vector.broadcast %4 : vector<1x128xf32> to vector<16x128xf32>
    %6 = arith.addf %3, %5 : vector<16x128xf32>
    %cst_5 = arith.constant 0.000000e+00 : f32
    %7 = vector.broadcast %cst_5 : f32 to vector<16x128xf32>
    %8 = arith.maximumf %6, %7 : vector<16x128xf32>
    %9 = arith.truncf %8 : vector<16x128xf32> to vector<16x128xbf16>
    %c0_6 = arith.constant 0 : index
    %c0_7 = arith.constant 0 : index
    %10 = vector.load %arg4[%c0_6, %c0_7] : memref<128x128xbf16, #tpu.memory_space<vmem>>, vector<128x128xbf16>
    %cst_8 = arith.constant dense<0.000000e+00> : vector<16x128xf32>
    %11 = tpu.matmul %9, %10, %cst_8 {dimension_numbers = #tpu.dot_dimension_numbers<[1], [0], [0], [1], [0, 0, 1, 1], [], []>} : vector<16x128xbf16>, vector<128x128xbf16>, vector<16x128xf32> -> vector<16x128xf32>
    %c0_9 = arith.constant 0 : index
    %c0_10 = arith.constant 0 : index
    %12 = vector.load %arg5[%c0_9, %c0_10] : memref<1x128xf32, #tpu.memory_space<vmem>>, vector<1x128xf32>
    %13 = vector.broadcast %12 : vector<1x128xf32> to vector<16x128xf32>
    %14 = arith.addf %11, %13 : vector<16x128xf32>
    %cst_11 = arith.constant 0.000000e+00 : f32
    %15 = vector.broadcast %cst_11 : f32 to vector<16x128xf32>
    %16 = arith.maximumf %14, %15 : vector<16x128xf32>
    %17 = arith.truncf %16 : vector<16x128xf32> to vector<16x128xbf16>
    %c0_12 = arith.constant 0 : index
    %c0_13 = arith.constant 0 : index
    %18 = vector.load %arg6[%c0_12, %c0_13] : memref<128x4xbf16, #tpu.memory_space<vmem>>, vector<128x4xbf16>
    %cst_14 = arith.constant dense<0.000000e+00> : vector<16x4xf32>
    %19 = tpu.matmul %17, %18, %cst_14 {dimension_numbers = #tpu.dot_dimension_numbers<[1], [0], [0], [1], [0, 0, 1, 1], [], []>} : vector<16x128xbf16>, vector<128x4xbf16>, vector<16x4xf32> -> vector<16x4xf32>
    %c0_15 = arith.constant 0 : index
    %c0_16 = arith.constant 0 : index
    %20 = vector.load %arg7[%c0_15, %c0_16] : memref<1x4xf32, #tpu.memory_space<vmem>>, vector<1x4xf32>
    %21 = vector.broadcast %20 : vector<1x4xf32> to vector<16x4xf32>
    %22 = arith.addf %19, %21 : vector<16x4xf32>
    %c0_17 = arith.constant 0 : index
    %c0_18 = arith.constant 0 : index
    %23 = vector.load %arg8[%c0_17, %c0_18] : memref<16x4xf32, #tpu.memory_space<vmem>>, vector<16x4xf32>
    tpu.vector_store %arg8[%c0_17, %c0_18], %22 {strides = array<i32>} : memref<16x4xf32, #tpu.memory_space<vmem>>, vector<16x4xf32>,
    return
  }
  func.func @transform_0(%arg0: i32) -> (i32, i32) {
    %c0_i32 = arith.constant 0 : i32
    %c0_i32_0 = arith.constant 0 : i32
    return %arg0, %c0_i32 : i32, i32
  }
  func.func @transform_1(%arg0: i32) -> (i32, i32) {
    %c0_i32 = arith.constant 0 : i32
    %c0_i32_0 = arith.constant 0 : i32
    %c0_i32_1 = arith.constant 0 : i32
    return %c0_i32, %c0_i32_0 : i32, i32
  }
  func.func @transform_2(%arg0: i32) -> (i32, i32) {
    %c0_i32 = arith.constant 0 : i32
    %c0_i32_0 = arith.constant 0 : i32
    %c0_i32_1 = arith.constant 0 : i32
    return %c0_i32, %c0_i32_0 : i32, i32
  }
  func.func @transform_3(%arg0: i32) -> (i32, i32) {
    %c0_i32 = arith.constant 0 : i32
    %c0_i32_0 = arith.constant 0 : i32
    %c0_i32_1 = arith.constant 0 : i32
    return %c0_i32, %c0_i32_0 : i32, i32
  }
  func.func @transform_4(%arg0: i32) -> (i32, i32) {
    %c0_i32 = arith.constant 0 : i32
    %c0_i32_0 = arith.constant 0 : i32
    %c0_i32_1 = arith.constant 0 : i32
    return %c0_i32, %c0_i32_0 : i32, i32
  }
  func.func @transform_5(%arg0: i32) -> (i32, i32) {
    %c0_i32 = arith.constant 0 : i32
    %c0_i32_0 = arith.constant 0 : i32
    %c0_i32_1 = arith.constant 0 : i32
    return %c0_i32, %c0_i32_0 : i32, i32
  }
  func.func @transform_6(%arg0: i32) -> (i32, i32) {
    %c0_i32 = arith.constant 0 : i32
    %c0_i32_0 = arith.constant 0 : i32
    %c0_i32_1 = arith.constant 0 : i32
    return %c0_i32, %c0_i32_0 : i32, i32
  }
  func.func @transform_7(%arg0: i32) -> (i32, i32) {
    %c0_i32 = arith.constant 0 : i32
    %c0_i32_0 = arith.constant 0 : i32
    return %arg0, %c0_i32 : i32, i32
  }
}

</mosaic_0001>

<bundles_post_ra>
// kernel: tpu_custom_call.1
= control target key start
LH: loop header
LB: loop body
LE: loop exit
PB: predicated region body
PF: predicated region fallthrough
CT: control target
= control target key end

     0   :  { %12 = vsyncpa [#allocation3], 0  ;;  %s475_s24 = smov [#allocation2]   ;;  %s621_s0 = inlined_call_operand.hbm [shape: f32[16,16], index: 0, kind: input, shape index: {}]   ;;  %s622_s1 = inlined_call_operand.vmem [shape: bf16[16,128], index: 1, kind: input, shape index: {}]   ;;  %s623_s2 = inlined_call_operand.vmem [shape: f32[1,128], index: 2, kind: input, shape index: {}]   ;;  %s624_s3 = inlined_call_operand.vmem [shape: bf16[128,128], index: 3, kind: input, shape index: {}]   ;;  %s625_s4 = inlined_call_operand.vmem [shape: f32[1,128], index: 4, kind: input, shape index: {}]   ;;  %s626_s5 = inlined_call_operand.vmem [shape: bf16[128,4], index: 5, kind: input, shape index: {}]   ;;  %s627_s6 = inlined_call_operand.vmem [shape: f32[1,4], index: 6, kind: input, shape index: {}]   ;;  %s628_s7 = inlined_call_operand.vmem [shape: f32[16,4], index: 7, kind: output, shape index: {}]  }
   0x1   :  { %s18_s25 = sshll.u32 %s475_s24, 4  ;;  %s451_s28 = scalar_lea.hbm %s621_s0, 256  ;;  %s19_s25 = int_to_ptr.vmem [resolvable:$true] %s18_s25 }
   0x2   :  { %p452_p0 = scmp.ne.s32.totalorder %s621_s0, %s451_s28  ;;  %p455_p1 = scmp.lt.u32.totalorder %s451_s28, %s621_s0 }
   0x4   :  { %p457_p2 = pnand %p455_p1, %p452_p0 }
   0x6   :  { %460 = shalt.err (!%p457_p2)
}
   0x7   :  { %s461_s10 = scalar_lea.vmem %s19_s25, 256  ;;  %p466_p4 = scmp.lt.s32.totalorder %s19_s25, %s19_s25 }
   0x8   :  { %p462_p3 = scmp.ne.s32.totalorder %s19_s25, %s461_s10  ;;  %p467_p5 = scmp.lt.s32.totalorder %s461_s10, %s461_s10 }
   0xa   :  { %p468_p6 = por %p467_p5, %p466_p4 }
   0xc   :  { %p469_p7 = pnand %p468_p6, %p462_p3 }
   0xe   :  { %472 = shalt.err (!%p469_p7)
}
   0xf   :  { %s476_s11 = smov 128   ;;  %s477_s12 = smov 8  }
  0x10   :  { %24 = dma.hbm_to_vmem [thread:$0]  %s621_s0, 256, %s19_s25, [#allocation3], %s476_s11, %s476_s11, %s477_s12  }
  0x11   :  { %473 = dma.done.wait [#allocation3], 256  }
  0x12   :  { %474 = vsyncadd [#allocation3], 4294967040  ;;  %v478_v0 = vmov 0.0   ;;  %vm479_vm0 = vmmov 0   ;;  %v434_v1 = vld [vmem:[%s622_s1] sm:$0xff]   ;;  %v42_v3 = vld [vmem:[#allocation2 + $0x8] sm:$0xff] }
  0x13   :  { %383 = vmatprep.subr.bf16.mxu0 %v478_v0  ;;  %385 = vmatprep.mubr.msk.bf16.mxu0 %vm479_vm0, %v478_v0  ;;  %v41_v2 = vld [vmem:[#allocation2] sm:$0xff]  ;;  %vm59_vm1 = vcmask 130048   ;;  %v436_v6 = vld [vmem:[%s624_s3 + $0x8] sm:$0xff]   ;;  %v437_v7 = vld [vmem:[%s624_s3 + $0x10] sm:$0xff]   ;;  %vm334_vm2 = vcmask 31744  }
  0x14   :  { %389 = vmatprep.subr.bf16.mxu1 %v478_v0  ;;  %405 = vmatprep.mubr.msk.bf16.mxu1 %vm479_vm0, %v478_v0  ;;  %v43_v4 = vpack.c.bf16 %v42_v3, %v41_v2  ;;  %v435_v5 = vld [vmem:[%s624_s3] sm:$0xff]   ;;  %v438_v8 = vld [vmem:[%s624_s3 + $0x18] sm:$0xff]   ;;  %v440_v10 = vld [vmem:[%s624_s3 + $0x28] sm:$0xff]  }
  0x15   :  { %384 = vmatpush3.bf16.msra.mxu0 %v434_v1  ;;  %390 = vmatpush3.bf16.msra.mxu1 %v435_v5  ;;  %v439_v9 = vld [vmem:[%s624_s3 + $0x20] sm:$0xff]   ;;  %v441_v11 = vld [vmem:[%s624_s3 + $0x30] sm:$0xff]   ;;  %v442_v12 = vld [vmem:[%s624_s3 + $0x38] sm:$0xff]  }
  0x16   :  { %409 = vmatprep.subr.bf16.mxu0 %v478_v0  ;;  %391 = vmatprep.subr.bf16.mxu1 %v478_v0  ;;  %v443_v13 = vld [vmem:[%s626_s5] sm:$0xff]   ;;  %v444_v14 = vld [vmem:[%s626_s5 + $0x8] sm:$0xff]   ;;  %v445_v15 = vld [vmem:[%s626_s5 + $0x10] sm:$0xff]  }
  0x17   :  { %v446_v16 = vld [vmem:[%s626_s5 + $0x18] sm:$0xff]   ;;  %v447_v17 = vld [vmem:[%s626_s5 + $0x20] sm:$0xff]   ;;  %v448_v18 = vld [vmem:[%s626_s5 + $0x28] sm:$0xff]  }
  0x18   :  { %386 = vmatmul.mubr.msk.bf16.vlgmr.msra.gmra.mrb[0].mxu0 %vm59_vm1, %v43_v4  ;;  %v342_v19 = vld [vmem:[%s623_s2] ss:$0 sm:$0xff]  ;;  %v449_v29 = vld [vmem:[%s626_s5 + $0x30] sm:$0xff]   ;;  %v450_v30 = vld [vmem:[%s626_s5 + $0x38] sm:$0xff]  }
  0x19   :  { %425 = vmatprep.mubr.msk.bf16.mxu0 %vm479_vm0, %v478_v0  ;;  %392 = vmatpush3.bf16.msra.mxu1 %v436_v6  ;;  %v345_v31 = vld [vmem:[%s625_s4] ss:$0 sm:$0xff] }
  0x1a   :  { %393 = vmatprep.subr.bf16.mxu1 %v478_v0  ;;  %410 = vmatpush3.bf16.msra.mxu0 %v443_v13  ;;  %v354_v41 = vld [vmem:[%s627_s6] ss:$0 sm:$0xff] }
  0x1b   :  { %411 = vmatprep.subr.bf16.mxu0 %v478_v0 }
  0x1d   :  { %394 = vmatpush3.bf16.msra.mxu1 %v437_v7 }
  0x1e   :  { %395 = vmatprep.subr.bf16.mxu1 %v478_v0  ;;  %412 = vmatpush3.bf16.msra.mxu0 %v444_v14 }
  0x1f   :  { %413 = vmatprep.subr.bf16.mxu0 %v478_v0 }
  0x21   :  { %396 = vmatpush3.bf16.msra.mxu1 %v438_v8 }
  0x22   :  { %397 = vmatprep.subr.bf16.mxu1 %v478_v0  ;;  %414 = vmatpush3.bf16.msra.mxu0 %v445_v15 }
  0x23   :  { %415 = vmatprep.subr.bf16.mxu0 %v478_v0 }
  0x25   :  { %398 = vmatpush3.bf16.msra.mxu1 %v439_v9 }
  0x26   :  { %399 = vmatprep.subr.bf16.mxu1 %v478_v0  ;;  %416 = vmatpush3.bf16.msra.mxu0 %v446_v16 }
  0x27   :  { %417 = vmatprep.subr.bf16.mxu0 %v478_v0 }
  0x29   :  { %400 = vmatpush3.bf16.msra.mxu1 %v440_v10 }
  0x2a   :  { %401 = vmatprep.subr.bf16.mxu1 %v478_v0  ;;  %418 = vmatpush3.bf16.msra.mxu0 %v447_v17 }
  0x2b   :  { %419 = vmatprep.subr.bf16.mxu0 %v478_v0 }
  0x2d   :  { %402 = vmatpush3.bf16.msra.mxu1 %v441_v11 }
  0x2e   :  { %403 = vmatprep.subr.bf16.mxu1 %v478_v0  ;;  %420 = vmatpush3.bf16.msra.mxu0 %v448_v18 }
  0x2f   :  { %421 = vmatprep.subr.bf16.mxu0 %v478_v0 }
  0x31   :  { %404 = vmatpush3.bf16.msra.mxu1 %v442_v12 }
  0x32   :  { %422 = vmatpush3.bf16.msra.mxu0 %v449_v29 }
  0x33   :  { %423 = vmatprep.subr.bf16.mxu0 %v478_v0 }
  0x36   :  { %424 = vmatpush3.bf16.msra.mxu0 %v450_v30 }
  0xeb   :  { %v97_v20 = vpop.f32.mrb[0].mxu0 }
  0xec   :  { %v98_v21 = vadd.f32 %v342_v19, %v97_v20  ;;  %v387_v22 = vpop.f32.mrb[1].mxu0 }
  0xed   :  { %v100_v23 = vpop.f32.mrb[2].mxu0 }
  0xee   :  { %v101_v24 = vadd.f32 %v342_v19, %v100_v23  ;;  %v388_v25 = vpop.f32.mrb[3].mxu0  ;;  %v104_v26 = vmax.f32 %v98_v21, 0.0 }
  0xf0   :  { %v105_v27 = vmax.f32 %v101_v24, 0.0 }
  0xf2   :  { %v106_v28 = vpack.c.bf16 %v105_v27, %v104_v26 }
  0xf4   :  { %406 = vmatmul.mubr.bf16.vlgmr.msra.gmra.mrb[0].mxu1 %v106_v28 }
 0x1c7   :  { %v212_v32 = vpop.f32.mrb[0].mxu1 }
 0x1c8   :  { %v213_v33 = vadd.f32 %v345_v31, %v212_v32  ;;  %v407_v34 = vpop.f32.mrb[1].mxu1 }
 0x1c9   :  { %v215_v35 = vpop.f32.mrb[2].mxu1 }
 0x1ca   :  { %v216_v36 = vadd.f32 %v345_v31, %v215_v35  ;;  %v408_v37 = vpop.f32.mrb[3].mxu1  ;;  %v219_v38 = vmax.f32 %v213_v33, 0.0 }
 0x1cc   :  { %v220_v39 = vmax.f32 %v216_v36, 0.0 }
 0x1ce   :  { %v221_v40 = vpack.c.bf16 %v220_v39, %v219_v38 }
 0x1d0   :  { %426 = vmatmul.mubr.bf16.vlgmr.msra.gmra.mrb[4].mxu0 %v221_v40 }
 0x2a3   :  { %v327_v42 = vpop.f32.mrb[4].mxu0 }
 0x2a4   :  { %v328_v43 = vadd.f32 %v354_v41, %v327_v42  ;;  %v427_v44 = vpop.f32.mrb[5].mxu0 }
 0x2a5   :  { %v330_v45 = vpop.f32.mrb[6].mxu0 }
 0x2a6   :  { %335 = vst.msk [vmem:[%s628_s7] sm:$0xff] %vm334_vm2, %v328_v43  ;;  %v331_v46 = vadd.f32 %v354_v41, %v330_v45  ;;  %v428_v47 = vpop.f32.mrb[7].mxu0 }
 0x2a8   :  { %336 = vst.msk [vmem:[%s628_s7 + $0x8] sm:$0xff] %vm334_vm2, %v331_v46 }
 0x2a9   :  { %341 = vsyncpa [#allocation3], 1 }

</bundles_post_ra>
